<compile_context>
chip_gen: v5e
topology: v5e:2x2
jax: 0.10.0
libtpu: 0.0.40
codegen_flags: <defaults>
</compile_context>

<pallas_src>
import math
import jax
import jax.numpy as jnp
from jax.experimental import pallas as pl
from jax.experimental.pallas import tpu as pltpu

# ---- FlowMLP config (flow_mlp_cfg) ----
DATA_HIDDEN = 32          # data_hidden_dim
TIME_HIDDEN = 16          # time_hidden_dim
CLS_HIDDEN = 16           # cls_hidden_dim
ENC_HIDDEN = 128          # MNISTEncoder internal width
HIDDEN_DIMS = (64, 64)    # cfg.hidden_dims
MAX_STEPS = 64
NUM_CLASSES = 10


def flow_mlp_kernel(x_ref, cond_ref,
                    ew1_ref, eb1_ref,
                    wf_ref, w2_ref, b2_ref, w3_ref, b3_ref,
                    o_ref):
    f32 = jnp.float32
    bf16 = jnp.bfloat16

    # --- MNISTEncoder layer 1: flatten -> Linear -> ReLU ---
    # x arrives f32; cast to bf16 in VMEM (hidden under DMA/MXU) for the MXU.
    x = x_ref[...].astype(bf16)
    h = jnp.dot(x, ew1_ref[...], preferred_element_type=f32) + eb1_ref[...]
    h = jnp.maximum(h, 0.0)

    # --- (encoder layer 2 folded into MLP layer 1) ---
    # z = relu(h @ (enc_w2 @ w1_data) + cond); cond carries b1, enc_b2@w1_data
    # and the label/time conditioning contributions (computed in the glue).
    z = jnp.dot(h.astype(bf16), wf_ref[...], preferred_element_type=f32) + cond_ref[...]
    z = jnp.maximum(z, 0.0)

    # --- MLP hidden layer 2 ---
    z = jnp.dot(z.astype(bf16), w2_ref[...], preferred_element_type=f32) + b2_ref[...]
    z = jnp.maximum(z, 0.0)

    # --- MLP output layer + Tanh ---
    v = jnp.dot(z.astype(bf16), w3_ref[...], preferred_element_type=f32) + b3_ref[...]
    o_ref[...] = jnp.tanh(v)


def _const_spec(shape):
    # Weights / biases: same (whole-array) block at every grid step -> loaded
    # once, VMEM-resident across the batch-tile loop.
    nd = len(shape)
    return pl.BlockSpec(shape, lambda i, _nd=nd: (0,) * _nd)


def flow_mlp_forward(t, x, cls, params, *, tm=1024):
    """t: (N,) f32, x: (N,C,H,W) f32, cls: (N,) int32 -> v_hat: (N,C,H,W) f32"""
    N, C, H, W = x.shape
    D_in = C * H * W
    bf16 = jnp.bfloat16
    f32 = jnp.float32

    # ---- glue: time embedding (sinusoidal, elementwise) ----
    half = TIME_HIDDEN // 2
    freqs = jnp.exp(-math.log(10000.0) * jnp.arange(half, dtype=f32) / half)
    ang = (t.astype(f32) * MAX_STEPS)[:, None] * freqs[None, :]
    time_lat = jnp.concatenate([jnp.sin(ang), jnp.cos(ang)], axis=1)      # (N, TIME_HIDDEN)

    # ---- glue: label embedding (tiny table gather) ----
    label_lat = jnp.take(params["label_emb"], cls, axis=0)                # (N, CLS_HIDDEN)

    # ---- glue: fold encoder layer 2 into MLP layer 1 (all in f32) ----
    w_fold = (params["enc_w2"] @ params["w1_data"]).astype(bf16)          # (ENC_HIDDEN, H1)
    cond = (time_lat @ params["w1_time"]
            + label_lat @ params["w1_cls"]
            + params["b1"]
            + params["enc_b2"] @ params["w1_data"]).astype(f32)           # (N, H1)
    h1 = cond.shape[1]

    # ---- glue: flatten NCHW row-major (pure view-like reshape) ----
    x_flat = x.reshape(N, D_in)                                           # stays f32

    # ---- batch tiling: TM multiple of 8; ragged last tile handled by Pallas
    #      masking (no padding / slicing round-trips through HBM). ----
    tm = max(8, ((tm + 7) // 8) * 8)
    if N < tm:
        tm = max(8, ((N + 7) // 8) * 8)
    grid = (pl.cdiv(N, tm),)
    # NOTE(v7x): for best use of the 2 TensorCores pick tm so grid[0] is even.

    ins = (
        x_flat, cond,
        params["enc_w1"].astype(bf16), params["enc_b1"],
        w_fold,
        params["w2"].astype(bf16), params["b2"],
        params["w3"].astype(bf16), params["b3"],
    )

    in_specs = [
        pl.BlockSpec((tm, D_in), lambda i: (i, 0)),   # streamed x tile (f32)
        pl.BlockSpec((tm, h1), lambda i: (i, 0)),     # streamed cond tile
    ] + [_const_spec(a.shape) for a in ins[2:]]        # resident weights/biases

    out_flat = pl.pallas_call(
        flow_mlp_kernel,
        out_shape=jax.ShapeDtypeStruct((N, D_in), f32),
        grid=grid,
        in_specs=in_specs,
        out_specs=pl.BlockSpec((tm, D_in), lambda i: (i, 0)),
        compiler_params=pltpu.CompilerParams(
            dimension_semantics=("parallel",),
            vmem_limit_bytes=32 * 1024 * 1024,   # large tiles also fit on v5e's default
        ),
    )(*ins)

    return out_flat.reshape(N, C, H, W)


def init_params(key, d_in, out_dim):
    """Deterministic parameter init (Kaiming-uniform-ish, like nn.Linear default)."""
    keys = jax.random.split(key, 16)
    ki = iter(keys)

    def lin(kw, kb, fan_in, fan_out):
        bound = 1.0 / math.sqrt(fan_in)
        w = jax.random.uniform(kw, (fan_in, fan_out), jnp.float32, -bound, bound)
        b = jax.random.uniform(kb, (1, fan_out), jnp.float32, -bound, bound)
        return w, b

    enc_w1, enc_b1 = lin(next(ki), next(ki), d_in, ENC_HIDDEN)
    enc_w2, enc_b2 = lin(next(ki), next(ki), ENC_HIDDEN, DATA_HIDDEN)

    mlp_in = DATA_HIDDEN + CLS_HIDDEN + TIME_HIDDEN
    w1, b1 = lin(next(ki), next(ki), mlp_in, HIDDEN_DIMS[0])
    w2, b2 = lin(next(ki), next(ki), HIDDEN_DIMS[0], HIDDEN_DIMS[1])
    w3, b3 = lin(next(ki), next(ki), HIDDEN_DIMS[1], out_dim)

    label_emb = jax.random.normal(next(ki), (NUM_CLASSES, CLS_HIDDEN), jnp.float32)

    # Split W1 rows to match cat([data_latent, label_latent, time_latent], dim=1)
    w1_data = w1[:DATA_HIDDEN]
    w1_cls = w1[DATA_HIDDEN:DATA_HIDDEN + CLS_HIDDEN]
    w1_time = w1[DATA_HIDDEN + CLS_HIDDEN:]

    return dict(
        enc_w1=enc_w1, enc_b1=enc_b1, enc_w2=enc_w2, enc_b2=enc_b2,
        w1_data=w1_data, w1_cls=w1_cls, w1_time=w1_time, b1=b1,
        w2=w2, b2=b2, w3=w3, b3=b3, label_emb=label_emb,
    )


def reference_forward(t, x, cls, params):
    """Pure-JAX f32 reference of the same forward pass (for correctness check)."""
    N, C, H, W = x.shape
    half = TIME_HIDDEN // 2
    freqs = jnp.exp(-math.log(10000.0) * jnp.arange(half, dtype=jnp.float32) / half)
    ang = (t.astype(jnp.float32) * MAX_STEPS)[:, None] * freqs[None, :]
    time_lat = jnp.concatenate([jnp.sin(ang), jnp.cos(ang)], axis=1)
    label_lat = jnp.take(params["label_emb"], cls, axis=0)
    x_flat = x.reshape(N, -1)
    h = jnp.maximum(x_flat @ params["enc_w1"] + params["enc_b1"], 0.0)
    data_lat = h @ params["enc_w2"] + params["enc_b2"]
    latent = jnp.concatenate([data_lat, label_lat, time_lat], axis=1)
    w1 = jnp.concatenate([params["w1_data"], params["w1_cls"], params["w1_time"]], axis=0)
    z = jnp.maximum(latent @ w1 + params["b1"], 0.0)
    z = jnp.maximum(z @ params["w2"] + params["b2"], 0.0)
    v = jnp.tanh(z @ params["w3"] + params["b3"])
    return v.reshape(N, C, H, W)


if __name__ == "__main__":
    # MNIST-like small shapes; N deliberately not a multiple of the batch tile
    # so the pad-free ragged-last-tile (masked write) path is exercised.
    N, C, H, W = 300, 1, 16, 16
    D_in = C * H * W
    out_dim = D_in                     # cfg.output_dim == C*H*W (v_hat.view(x.shape))

    key = jax.random.PRNGKey(0)
    k_x, k_t, k_c, k_p = jax.random.split(key, 4)
    x = jax.random.normal(k_x, (N, C, H, W), jnp.float32)
    t = jax.random.uniform(k_t, (N,), jnp.float32)
    cls = jax.random.randint(k_c, (N,), 0, NUM_CLASSES, jnp.int32)

    params = init_params(k_p, D_in, out_dim)

    # tm=128 -> grid=(3,) with a partial last tile; production default is tm=1024.
    v_hat = flow_mlp_forward(t, x, cls, params, tm=128)
    v_hat = jax.block_until_ready(v_hat)

    v_ref = reference_forward(t, x, cls, params)
    assert v_hat.shape == x.shape and v_hat.dtype == jnp.float32
    # bf16 MXU operands with f32 accumulation (and in-kernel bf16 x cast) ->
    # loose tolerance vs the pure-f32 reference; accepted precision tradeoff.
    assert jnp.allclose(v_hat, v_ref, atol=5e-2, rtol=5e-2), "mismatch vs JAX reference"

    print("KERNEL_OK")
</pallas_src>

<mosaic_0001>
module attributes {stable_mosaic.version = 11 : i64} {
  func.func @flow_mlp_kernel(%arg0: i32, %arg1: memref<128x256xf32, #tpu.memory_space<vmem>>, %arg2: memref<128x64xf32, #tpu.memory_space<vmem>>, %arg3: memref<256x128xbf16, #tpu.memory_space<vmem>>, %arg4: memref<1x128xf32, #tpu.memory_space<vmem>>, %arg5: memref<128x64xbf16, #tpu.memory_space<vmem>>, %arg6: memref<64x64xbf16, #tpu.memory_space<vmem>>, %arg7: memref<1x64xf32, #tpu.memory_space<vmem>>, %arg8: memref<64x256xbf16, #tpu.memory_space<vmem>>, %arg9: memref<1x256xf32, #tpu.memory_space<vmem>>, %arg10: memref<128x256xf32, #tpu.memory_space<vmem>>) attributes {dimension_semantics = [#tpu.dimension_semantics<parallel>], iteration_bounds = array<i64: 3>, scalar_prefetch = 0 : i64, scratch_operands = 0 : i64, tpu.core_type = #tpu.core_type<tc>, window_params = [{transform_indices = @transform_0, window_bounds = array<i64: 128, 256>}, {transform_indices = @transform_1, window_bounds = array<i64: 128, 64>}, {pipeline_mode = #tpu.pipeline_mode<synchronous>, transform_indices = @transform_2, window_bounds = array<i64: 256, 128>}, {pipeline_mode = #tpu.pipeline_mode<synchronous>, transform_indices = @transform_3, window_bounds = array<i64: 1, 128>}, {pipeline_mode = #tpu.pipeline_mode<synchronous>, transform_indices = @transform_4, window_bounds = array<i64: 128, 64>}, {pipeline_mode = #tpu.pipeline_mode<synchronous>, transform_indices = @transform_5, window_bounds = array<i64: 64, 64>}, {pipeline_mode = #tpu.pipeline_mode<synchronous>, transform_indices = @transform_6, window_bounds = array<i64: 1, 64>}, {pipeline_mode = #tpu.pipeline_mode<synchronous>, transform_indices = @transform_7, window_bounds = array<i64: 64, 256>}, {pipeline_mode = #tpu.pipeline_mode<synchronous>, transform_indices = @transform_8, window_bounds = array<i64: 1, 256>}, {transform_indices = @transform_9, window_bounds = array<i64: 128, 256>}]} {
    %c0 = arith.constant 0 : index
    %c0_0 = arith.constant 0 : index
    %0 = vector.load %arg1[%c0, %c0_0] : memref<128x256xf32, #tpu.memory_space<vmem>>, vector<128x256xf32>
    %1 = arith.truncf %0 : vector<128x256xf32> to vector<128x256xbf16>
    %c0_1 = arith.constant 0 : index
    %c0_2 = arith.constant 0 : index
    %2 = vector.load %arg3[%c0_1, %c0_2] : memref<256x128xbf16, #tpu.memory_space<vmem>>, vector<256x128xbf16>
    %cst = arith.constant dense<0.000000e+00> : vector<128x128xf32>
    %3 = tpu.matmul %1, %2, %cst {dimension_numbers = #tpu.dot_dimension_numbers<[1], [0], [0], [1], [0, 0, 1, 1], [], []>} : vector<128x256xbf16>, vector<256x128xbf16>, vector<128x128xf32> -> vector<128x128xf32>
    %c0_3 = arith.constant 0 : index
    %c0_4 = arith.constant 0 : index
    %4 = vector.load %arg4[%c0_3, %c0_4] : memref<1x128xf32, #tpu.memory_space<vmem>>, vector<1x128xf32>
    %5 = vector.broadcast %4 : vector<1x128xf32> to vector<128x128xf32>
    %6 = arith.addf %3, %5 : vector<128x128xf32>
    %cst_5 = arith.constant 0.000000e+00 : f32
    %7 = vector.broadcast %cst_5 : f32 to vector<128x128xf32>
    %8 = arith.maximumf %6, %7 : vector<128x128xf32>
    %9 = arith.truncf %8 : vector<128x128xf32> to vector<128x128xbf16>
    %c0_6 = arith.constant 0 : index
    %c0_7 = arith.constant 0 : index
    %10 = vector.load %arg5[%c0_6, %c0_7] : memref<128x64xbf16, #tpu.memory_space<vmem>>, vector<128x64xbf16>
    %cst_8 = arith.constant dense<0.000000e+00> : vector<128x64xf32>
    %11 = tpu.matmul %9, %10, %cst_8 {dimension_numbers = #tpu.dot_dimension_numbers<[1], [0], [0], [1], [0, 0, 1, 1], [], []>} : vector<128x128xbf16>, vector<128x64xbf16>, vector<128x64xf32> -> vector<128x64xf32>
    %c0_9 = arith.constant 0 : index
    %c0_10 = arith.constant 0 : index
    %12 = vector.load %arg2[%c0_9, %c0_10] : memref<128x64xf32, #tpu.memory_space<vmem>>, vector<128x64xf32>
    %13 = arith.addf %11, %12 : vector<128x64xf32>
    %cst_11 = arith.constant 0.000000e+00 : f32
    %14 = vector.broadcast %cst_11 : f32 to vector<128x64xf32>
    %15 = arith.maximumf %13, %14 : vector<128x64xf32>
    %16 = arith.truncf %15 : vector<128x64xf32> to vector<128x64xbf16>
    %c0_12 = arith.constant 0 : index
    %c0_13 = arith.constant 0 : index
    %17 = vector.load %arg6[%c0_12, %c0_13] : memref<64x64xbf16, #tpu.memory_space<vmem>>, vector<64x64xbf16>
    %cst_14 = arith.constant dense<0.000000e+00> : vector<128x64xf32>
    %18 = tpu.matmul %16, %17, %cst_14 {dimension_numbers = #tpu.dot_dimension_numbers<[1], [0], [0], [1], [0, 0, 1, 1], [], []>} : vector<128x64xbf16>, vector<64x64xbf16>, vector<128x64xf32> -> vector<128x64xf32>
    %c0_15 = arith.constant 0 : index
    %c0_16 = arith.constant 0 : index
    %19 = vector.load %arg7[%c0_15, %c0_16] : memref<1x64xf32, #tpu.memory_space<vmem>>, vector<1x64xf32>
    %20 = vector.broadcast %19 : vector<1x64xf32> to vector<128x64xf32>
    %21 = arith.addf %18, %20 : vector<128x64xf32>
    %cst_17 = arith.constant 0.000000e+00 : f32
    %22 = vector.broadcast %cst_17 : f32 to vector<128x64xf32>
    %23 = arith.maximumf %21, %22 : vector<128x64xf32>
    %24 = arith.truncf %23 : vector<128x64xf32> to vector<128x64xbf16>
    %c0_18 = arith.constant 0 : index
    %c0_19 = arith.constant 0 : index
    %25 = vector.load %arg8[%c0_18, %c0_19] : memref<64x256xbf16, #tpu.memory_space<vmem>>, vector<64x256xbf16>
    %cst_20 = arith.constant dense<0.000000e+00> : vector<128x256xf32>
    %26 = tpu.matmul %24, %25, %cst_20 {dimension_numbers = #tpu.dot_dimension_numbers<[1], [0], [0], [1], [0, 0, 1, 1], [], []>} : vector<128x64xbf16>, vector<64x256xbf16>, vector<128x256xf32> -> vector<128x256xf32>
    %c0_21 = arith.constant 0 : index
    %c0_22 = arith.constant 0 : index
    %27 = vector.load %arg9[%c0_21, %c0_22] : memref<1x256xf32, #tpu.memory_space<vmem>>, vector<1x256xf32>
    %28 = vector.broadcast %27 : vector<1x256xf32> to vector<128x256xf32>
    %29 = arith.addf %26, %28 : vector<128x256xf32>
    %30 = math.tanh %29 : vector<128x256xf32>
    %c0_23 = arith.constant 0 : index
    %c0_24 = arith.constant 0 : index
    %31 = vector.load %arg10[%c0_23, %c0_24] : memref<128x256xf32, #tpu.memory_space<vmem>>, vector<128x256xf32>
    tpu.vector_store %arg10[%c0_23, %c0_24], %30 {strides = array<i32>} : memref<128x256xf32, #tpu.memory_space<vmem>>, vector<128x256xf32>,
    return
  }
  func.func @transform_0(%arg0: i32) -> (i32, i32) {
    %c0_i32 = arith.constant 0 : i32
    %c0_i32_0 = arith.constant 0 : i32
    return %arg0, %c0_i32 : i32, i32
  }
  func.func @transform_1(%arg0: i32) -> (i32, i32) {
    %c0_i32 = arith.constant 0 : i32
    %c0_i32_0 = arith.constant 0 : i32
    return %arg0, %c0_i32 : i32, i32
  }
  func.func @transform_2(%arg0: i32) -> (i32, i32) {
    %c0_i32 = arith.constant 0 : i32
    %c0_i32_0 = arith.constant 0 : i32
    %c0_i32_1 = arith.constant 0 : i32
    return %c0_i32, %c0_i32_0 : i32, i32
  }
  func.func @transform_3(%arg0: i32) -> (i32, i32) {
    %c0_i32 = arith.constant 0 : i32
    %c0_i32_0 = arith.constant 0 : i32
    %c0_i32_1 = arith.constant 0 : i32
    return %c0_i32, %c0_i32_0 : i32, i32
  }
  func.func @transform_4(%arg0: i32) -> (i32, i32) {
    %c0_i32 = arith.constant 0 : i32
    %c0_i32_0 = arith.constant 0 : i32
    %c0_i32_1 = arith.constant 0 : i32
    return %c0_i32, %c0_i32_0 : i32, i32
  }
  func.func @transform_5(%arg0: i32) -> (i32, i32) {
    %c0_i32 = arith.constant 0 : i32
    %c0_i32_0 = arith.constant 0 : i32
    %c0_i32_1 = arith.constant 0 : i32
    return %c0_i32, %c0_i32_0 : i32, i32
  }
  func.func @transform_6(%arg0: i32) -> (i32, i32) {
    %c0_i32 = arith.constant 0 : i32
    %c0_i32_0 = arith.constant 0 : i32
    %c0_i32_1 = arith.constant 0 : i32
    return %c0_i32, %c0_i32_0 : i32, i32
  }
  func.func @transform_7(%arg0: i32) -> (i32, i32) {
    %c0_i32 = arith.constant 0 : i32
    %c0_i32_0 = arith.constant 0 : i32
    %c0_i32_1 = arith.constant 0 : i32
    return %c0_i32, %c0_i32_0 : i32, i32
  }
  func.func @transform_8(%arg0: i32) -> (i32, i32) {
    %c0_i32 = arith.constant 0 : i32
    %c0_i32_0 = arith.constant 0 : i32
    %c0_i32_1 = arith.constant 0 : i32
    return %c0_i32, %c0_i32_0 : i32, i32
  }
  func.func @transform_9(%arg0: i32) -> (i32, i32) {
    %c0_i32 = arith.constant 0 : i32
    %c0_i32_0 = arith.constant 0 : i32
    return %arg0, %c0_i32 : i32, i32
  }
}

</mosaic_0001>

<bundles_post_ra>
// kernel: tpu_custom_call.1
= control target key start
LH: loop header
LB: loop body
LE: loop exit
PB: predicated region body
PF: predicated region fallthrough
CT: control target
= control target key end

     0   :  { %14 = vsyncpa [#allocation3], 0  ;;  %s2419_s0 = inlined_call_operand.hbm [shape: f32[300,256], index: 0, kind: input, shape index: {}]   ;;  %s2420_s1 = inlined_call_operand.vmem [shape: f32[300,64], index: 1, kind: input, shape index: {}]   ;;  %s2421_s2 = inlined_call_operand.vmem [shape: bf16[256,128], index: 2, kind: input, shape index: {}]   ;;  %s2422_s3 = inlined_call_operand.vmem [shape: f32[1,128], index: 3, kind: input, shape index: {}]   ;;  %s2423_s4 = inlined_call_operand.vmem [shape: bf16[128,64], index: 4, kind: input, shape index: {}]   ;;  %s2424_s5 = inlined_call_operand.vmem [shape: bf16[64,64], index: 5, kind: input, shape index: {}]   ;;  %s2425_s6 = inlined_call_operand.vmem [shape: f32[1,64], index: 6, kind: input, shape index: {}]   ;;  %s2426_s7 = inlined_call_operand.vmem [shape: bf16[64,256], index: 7, kind: input, shape index: {}]   ;;  %s2427_s8 = inlined_call_operand.vmem [shape: f32[1,256], index: 8, kind: input, shape index: {}]   ;;  %s2428_s9 = inlined_call_operand.hbm [shape: f32[300,256], index: 9, kind: output, shape index: {}]  }
   0x1   :  { %16 = vsyncpa [#allocation3 + $0x1], 0 }
   0x2   :  { %17 = vsyncpa [#allocation4], 0 }
   0x3   :  { %19 = vsyncpa [#allocation4 + $0x1], 0  ;;  %s1889_s30 = smov 0   ;;  %s1891_s10 = smov 0  }
   0x4   :  { %s1893_s11 = smov 0   ;;  %s1895_s12 = smov 0  }
   0x5 LB: > { %2434 = sst [smem:[#allocation8_spill]] %s1827_s11  ;;  %s1910_s13 = sadd.s32 4294967295, %s1831_s12   ;;  %s1831_s12 = sphi %s1895_s12, %s2445_s12   ;;  %s1827_s11 = sphi %s1893_s11, %s2447_s11   ;;  %s1823_s10 = sphi %s1891_s10, %s2449_s10   ;;  %s1819_s30 = sphi %s1889_s30, %s2448_s30  }
   0x6   : > { %s1356_s14 = sadd.s32 4294967294, %s1831_s12   ;;  %s1914_s15 = sadd.s32 1, %s1831_s12  }
   0x7   : > { %2435 = sst [smem:[#allocation9_spill]] %s1914_s15  ;;  %s32_s16 = sadd.s32 1, %s1827_s11 }
   0x8   : > { %s29_s17 = ssub.s32 %s1831_s12, %s1914_s15  ;;  %p39_p0 = scmp.ne.s32.totalorder %s1827_s11, %s1823_s10 }
   0x9   : > { %p30_p1 = scmp.eq.s32.totalorder %s29_s17, 0  ;;  %p40_p2 = scmp.eq.s32.totalorder %s1831_s12, 0 }
   0xa   : > { %p45_p3 = scmp.ne.s32.totalorder %s1823_s10, %s1819_s30  ;;  %p46_p4 = scmp.eq.s32.totalorder %s1910_s13, 0 }
   0xb   : > { %s1926_s18 = scalar_select %p30_p1, %s1827_s11, %s32_s16  }
   0xc   : > { %p41_p5 = por %p40_p2, %p39_p0  ;;  %p1928_p6 = por %p46_p4, %p45_p3 }
   0xd   : > { %2436 = sst [smem:[#allocation10_spill]] %s1926_s18  ;;  %p242_p7 = scmp.eq.s32.totalorder %s1910_s13, 2 }
   0xe   : > { %p248_p8 = scmp.eq.s32.totalorder %s1356_s14, 2  ;;  %p1358_p11 = scmp.ge.s32.totalorder %s1831_s12, 3 }
   0xf   : > { %p1933_p9 = por %p242_p7, %p39_p0 }
  0x10   : > { %p1937_p10 = por %p248_p8, %p45_p3  ;;  %285 = sbr.rel (%p1358_p11) target bundleno = 58 (0x3a), region = 44 }
  0x12   : > { %s2439_s21 = scalar_select %p1937_p10, 1, 0 }
  0x14   : > { %2440 = sst [smem:[#allocation11_spill]] %s2439_s21 }
  0x15   : > { %288 = sbr.rel (!%p41_p5) target bundleno = 58 (0x3a), region = 48  ;;  %s289_s22 = sand.u32 (%p41_p5), 1, %s1827_s11  }
  0x16   : > { %s1360_s23 = sshll.u32 (%p41_p5), %s1831_s12, 4  ;;  %s1359_s24 = sshll.u32 (%p41_p5), %s289_s22, 8 }
  0x17   : > { %s295_s25 = ssub.s32 (%p41_p5), 38, %s1360_s23  ;;  %s1947_s29 = scalar_lea.sflag (%p41_p5), [#allocation3], %s289_s22 }
  0x18   : > { %p296_p12 = scmp.lt.s32.totalorder (%p41_p5), %s295_s25, 16  ;;  %s293_s14 = scalar_lea.vmem (%p41_p5), [#allocation2], %s1359_s24 }
  0x1a   : > { %s2451_s25 = smov (!%p296_p12, %s295_s25), 16 }
  0x1b   : > { %s1552_s26 = sshll.u32 %s2451_s25, 4 }
  0x1c   : > { %s300_s27 = ssub.s32 256, %s1552_s26 }
  0x1d   : > { %s301_s28 = sshll.u32 %s300_s27, 4 }
  0x1e   : > { %302 = vsyncadd %s1947_s29, %s301_s28  ;;  %p1950_p13 = scmp.ne.s32.totalorder %s1552_s26, 0  ;;  %s1554_s17 = sshll.u32 %s1831_s12, 8 }
  0x1f   : > { %s306_s11 = scalar_lea.hbm %s2419_s0, %s1554_s17  ;;  %s1958_s15 = sshll.u32 %s293_s14, 4  ;;  %s311_s15 = int_to_ptr.vmem [resolvable:$true] %s1958_s15 }
  0x20   : > { %s308_s22 = sshll.u32 %s306_s11, 4  ;;  %s2432_s24 = sshll.u32 %s2451_s25, 8  ;;  %s1961_s22 = int_to_ptr.hbm [resolvable:$true] %s308_s22 }
  0x21   : > { %s1715_s27 = sshra.s32 %s1961_s22, 4  ;;  %s1717_s26 = sshrl.u32 %s2432_s24, 4  ;;  %s1716_s27 = int_to_ptr.hbm [resolvable:$true] %s1715_s27 }
  0x22   : > { %s1722_s28 = scalar_lea.hbm %s1716_s27, %s1717_s26  ;;  %s1726_s14 = scalar_lea.hbm %s2419_s0, 608 }
  0x23   : > { %p1723_p0 = scmp.ne.s32.totalorder %s1716_s27, %s1722_s28  ;;  %p1727_p3 = scmp.lt.s32.totalorder %s1716_s27, %s2419_s0 }
  0x24   : > { %p1728_p4 = scmp.lt.s32.totalorder %s1726_s14, %s1722_s28 }
  0x25   : > { %p1724_p1 = pnand %p1723_p0, %p1950_p13 }
  0x26   : > { %p1729_p5 = por %p1728_p4, %p1727_p3 }
  0x27   : > { %p1725_p2 = pneg %p1724_p1 }
  0x29   : > { %p1730_p7 = pnand %p1729_p5, %p1725_p2 }
  0x2b   : > { %1733 = shalt.err (!%p1730_p7)
}
  0x2c   : > { %s1734_s24 = sshra.s32 %s311_s15, 4  ;;  %s1833_s18 = smov [#allocation2]   ;;  %s1735_s24 = int_to_ptr.vmem [resolvable:$true] %s1734_s24 }
  0x2d   : > { %s1741_s21 = scalar_lea.vmem %s1735_s24, %s1717_s26  ;;  %s1745_s17 = scalar_lea.vmem %s1833_s18, 512 }
  0x2e   : > { %p1742_p8 = scmp.ne.s32.totalorder %s1735_s24, %s1741_s21  ;;  %p1747_p0 = scmp.lt.s32.totalorder %s1745_s17, %s1741_s21 }
  0x30   : > { %p1743_p11 = pnand %p1742_p8, %p1950_p13 }
  0x32   : > { %p1744_p12 = pneg %p1743_p11 }
  0x34   : > { %p1749_p1 = pnand %p1747_p0, %p1744_p12 }
  0x36   : > { %1752 = shalt.err (!%p1749_p1)
}
  0x37   : > { %s1834_s27 = smov 256   ;;  %s1835_s28 = smov 16  }
  0x38   : > { %s2442_s14 = sshll.u32 %s2451_s25, 8 }
  0x39   : > { %316 = dma.hbm_to_vmem [thread:$0]  (%p1950_p13), %s1961_s22, %s2442_s14, %s311_s15, %s1947_s29, %s1834_s27, %s1834_s27, %s1835_s28  }
  0x3a PF: > { %p1368_p2 = scmp.ge.s32.totalorder %s1831_s12, 1  ;;  %p335_p3 = scmp.lt.s32.totalorder %s1831_s12, 4 }
  0x3c   : > { %p336_p4 = pnand %p1368_p2, %p335_p3 }
  0x3d   : > { %s1990_s21 = sand.u32 (!%p336_p4), 1, %s1823_s10  }
  0x3e   : > { %339 = sbr.rel (%p336_p4) target bundleno = 889 (0x379), region = 56  ;;  %s1369_s24 = sshll.u32 (!%p336_p4), %s1990_s21, 8 }
  0x3f   : > { %s342_s16 = scalar_lea.sflag (!%p336_p4), [#allocation3], %s1990_s21  ;;  %s1996_s25 = scalar_lea.vmem (!%p336_p4), [#allocation2], %s1369_s24 }
  0x43   : > { %1810 = dma.done.wait (%p1928_p6), %s342_s16, 4096  }
  0x44   : > { %1812 = vsyncadd (%p1928_p6), %s342_s16, 4294963200  ;;  %v1562_v0 = vld [vmem:[%s2421_s2 + $0x38] sm:$0xff]  ;;  %v1561_v1 = vld [vmem:[%s2421_s2 + $0x30] sm:$0xff]  ;;  %s2164_s11 = sshll.u32 %s1910_s13, 4  ;;  %vm908_vm0 = vcmask 523264   ;;  %s2294_s27 = scalar_lea.vmem [#allocation5], %s1369_s24 }
  0x45   : > { %1594 = vmatpush.bf16.msra.mxu1 %v1562_v0  ;;  %597 = vmatpush.bf16.msra.mxu0 %v1562_v0  ;;  %v1560_v2 = vld [vmem:[%s2421_s2 + $0x28] sm:$0xff]  ;;  %v1559_v3 = vld [vmem:[%s2421_s2 + $0x20] sm:$0xff]  ;;  %v1558_v4 = vld [vmem:[%s2421_s2 + $0x18] sm:$0xff]  ;;  %p401_p6 = scmp.lt.s32.totalorder %s2164_s11, 37  ;;  %s1247_s24 = scalar_lea.sflag [#allocation4], %s1990_s21 }
  0x46   : > { %v1557_v5 = vld [vmem:[%s2421_s2 + $0x10] sm:$0xff]  ;;  %v1556_v6 = vld [vmem:[%s2421_s2 + $0x8] sm:$0xff]  ;;  %v1555_v7 = vld [vmem:[%s2421_s2] sm:$0xff]  ;;  %s1255_s14 = ssub.s32 (%p1933_p9), 38, %s2164_s11 }
  0x47   : > { %v433_v8 = vld [vmem:[%s1996_s25 + $0x80] sm:$0xff]  ;;  %v435_v9 = vld [vmem:[%s1996_s25 + $0x90] sm:$0xff]  ;;  %v1570_v10 = vld [vmem:[%s2421_s2 + $0x78] sm:$0xff]  ;;  %s402_s19 = scalar_select %p401_p6, %s2164_s11, 37 }
  0x48   : > { %v457_v11 = vpack.c.bf16 %v435_v9, %v433_v8  ;;  %v1569_v12 = vld [vmem:[%s2421_s2 + $0x70] sm:$0xff]  ;;  %v1568_v13 = vld [vmem:[%s2421_s2 + $0x68] sm:$0xff]  ;;  %v1567_v14 = vld [vmem:[%s2421_s2 + $0x60] sm:$0xff]  ;;  %p1256_p13 = scmp.lt.s32.totalorder (%p1933_p9), %s1255_s14, 16 }
  0x49   : > { %1595 = vmatpush.bf16.msra.mxu1 %v1561_v1  ;;  %598 = vmatpush.bf16.msra.mxu0 %v1561_v1  ;;  %v437_v15 = vld [vmem:[%s1996_s25 + $0xa0] sm:$0xff]  ;;  %v439_v16 = vld [vmem:[%s1996_s25 + $0xb0] sm:$0xff]  ;;  %v1566_v17 = vld [vmem:[%s2421_s2 + $0x58] sm:$0xff]  ;;  %s1372_s18 = sshll.u32 %s402_s19, 3 }
  0x4a   : > { %v459_v18 = vpack.c.bf16 %v439_v16, %v437_v15  ;;  %v1565_v19 = vld [vmem:[%s2421_s2 + $0x50] sm:$0xff]  ;;  %v417_v20 = vld [vmem:[%s1996_s25] sm:$0xff]  ;;  %v1564_v23 = vld [vmem:[%s2421_s2 + $0x48] sm:$0xff]  ;;  %s2171_s28 = scalar_lea.vmem %s2420_s1, %s1372_s18 }
  0x4b   : > { %v419_v21 = vld [vmem:[%s1996_s25 + $0x10] sm:$0xff]  ;;  %v1563_v24 = vld [vmem:[%s2421_s2 + $0x40] sm:$0xff]  ;;  %v418_v37 = vld [vmem:[%s1996_s25 + $0x8] sm:$0xff] }
  0x4c   : > { %v449_v22 = vpack.c.bf16 %v419_v21, %v417_v20  ;;  %v441_v25 = vld [vmem:[%s1996_s25 + $0xc0] sm:$0xff]  ;;  %v443_v26 = vld [vmem:[%s1996_s25 + $0xd0] sm:$0xff]  ;;  %v420_v38 = vld [vmem:[%s1996_s25 + $0x18] sm:$0xff] }
  0x4d   : > { %1596 = vmatpush.bf16.msra.mxu1 %v1560_v2  ;;  %599 = vmatpush.bf16.msra.mxu0 %v1560_v2  ;;  %v461_v27 = vpack.c.bf16 %v443_v26, %v441_v25  ;;  %v421_v28 = vld [vmem:[%s1996_s25 + $0x20] sm:$0xff]  ;;  %v423_v29 = vld [vmem:[%s1996_s25 + $0x30] sm:$0xff]  ;;  %v450_v39 = vpack.c.bf16 %v420_v38, %v418_v37  ;;  %v422_v43 = vld [vmem:[%s1996_s25 + $0x28] sm:$0xff] }
  0x4e   : > { %v451_v30 = vpack.c.bf16 %v423_v29, %v421_v28  ;;  %v445_v31 = vld [vmem:[%s1996_s25 + $0xe0] sm:$0xff]  ;;  %v447_v32 = vld [vmem:[%s1996_s25 + $0xf0] sm:$0xff]  ;;  %v424_v44 = vld [vmem:[%s1996_s25 + $0x38] sm:$0xff] }
  0x4f   : > { %v463_v33 = vpack.c.bf16 %v447_v32, %v445_v31  ;;  %v425_v34 = vld [vmem:[%s1996_s25 + $0x40] sm:$0xff]  ;;  %v427_v35 = vld [vmem:[%s1996_s25 + $0x50] sm:$0xff]  ;;  %v452_v45 = vpack.c.bf16 %v424_v44, %v422_v43  ;;  %v426_v46 = vld [vmem:[%s1996_s25 + $0x48] sm:$0xff] }
  0x50   : > { %v453_v36 = vpack.c.bf16 %v427_v35, %v425_v34  ;;  %v429_v40 = vld [vmem:[%s1996_s25 + $0x60] sm:$0xff]  ;;  %v431_v41 = vld [vmem:[%s1996_s25 + $0x70] sm:$0xff]  ;;  %v428_v47 = vld [vmem:[%s1996_s25 + $0x58] sm:$0xff] }
  0x51   : > { %1597 = vmatpush.bf16.msra.mxu1 %v1559_v3  ;;  %600 = vmatpush.bf16.msra.mxu0 %v1559_v3  ;;  %v455_v42 = vpack.c.bf16 %v431_v41, %v429_v40  ;;  %v454_v48 = vpack.c.bf16 %v428_v47, %v426_v46  ;;  %v430_v49 = vld [vmem:[%s1996_s25 + $0x68] sm:$0xff]  ;;  %v432_v50 = vld [vmem:[%s1996_s25 + $0x78] sm:$0xff]  ;;  %v1577_v62 = vld [vmem:[%s2423_s4 + $0x30] sm:$0xff] }
  0x52   : > { %v456_v51 = vpack.c.bf16 %v432_v50, %v430_v49  ;;  %v434_v52 = vld [vmem:[%s1996_s25 + $0x88] sm:$0xff]  ;;  %v436_v53 = vld [vmem:[%s1996_s25 + $0x98] sm:$0xff]  ;;  %v1575_v1 = vld [vmem:[%s2423_s4 + $0x20] sm:$0xff] }
  0x53   : > { %v458_v54 = vpack.c.bf16 %v436_v53, %v434_v52  ;;  %v438_v57 = vld [vmem:[%s1996_s25 + $0xa8] sm:$0xff]  ;;  %v440_v58 = vld [vmem:[%s1996_s25 + $0xb8] sm:$0xff]  ;;  %v1581_v44 = vld [vmem:[%s2424_s5 + $0x10] sm:$0xff] }
  0x54   : > { %v1578_v59 = vld [vmem:[%s2423_s4 + $0x38] sm:$0xff]  ;;  %v460_v60 = vpack.c.bf16 %v440_v58, %v438_v57  ;;  %v1576_v63 = vld [vmem:[%s2423_s4 + $0x28] sm:$0xff] }
  0x55   : > { %1598 = vmatpush.bf16.msra.mxu1 %v1558_v4  ;;  %601 = vmatpush.bf16.msra.mxu0 %v1558_v4  ;;  %v442_v2 = vld [vmem:[%s1996_s25 + $0xc8] sm:$0xff]  ;;  %v444_v3 = vld [vmem:[%s1996_s25 + $0xd8] sm:$0xff] }
  0x56   : > { %799 = vmatpush.bf16.msra.mxu2 %v1578_v59  ;;  %v1574_v4 = vld [vmem:[%s2423_s4 + $0x18] sm:$0xff]  ;;  %v1572_v8 = vld [vmem:[%s2423_s4 + $0x8] sm:$0xff] }
  0x59   : > { %1599 = vmatpush.bf16.msra.mxu1 %v1557_v5  ;;  %602 = vmatpush.bf16.msra.mxu0 %v1557_v5  ;;  %v462_v5 = vpack.c.bf16 %v444_v3, %v442_v2 }
  0x5a   : > { %800 = vmatpush.bf16.msra.mxu2 %v1577_v62 }
  0x5d   : > { %1600 = vmatpush.bf16.msra.mxu1 %v1556_v6  ;;  %603 = vmatpush.bf16.msra.mxu0 %v1556_v6 }
  0x5e   : > { %801 = vmatpush.bf16.msra.mxu2 %v1576_v63 }
  0x61   : > { %1601 = vmatpush.bf16.msra.mxu1 %v1555_v7  ;;  %604 = vmatpush.bf16.msra.mxu0 %v1555_v7  ;;  %v1573_v7 = vld [vmem:[%s2423_s4 + $0x10] sm:$0xff] }
  0x62   : > { %802 = vmatpush.bf16.msra.mxu2 %v1575_v1 }
  0x64   : > { %625 = vmatmul.bf16.vlgmr.msra.gmra.mxu1 %v457_v11  ;;  %605 = vmatmul.bf16.vlgmr.msra.gmra.mxu0 %v449_v22  ;;  %v446_v11 = vld [vmem:[%s1996_s25 + $0xe8] sm:$0xff]  ;;  %v1582_v22 = vld [vmem:[%s2424_s5 + $0x18] sm:$0xff] }
  0x65   : > { %646 = vmatpush.bf16.msrb.mxu1 %v1570_v10  ;;  %v1571_v10 = vld [vmem:[%s2423_s4] sm:$0xff]  ;;  %1602 = vmatpush.bf16.msra.mxu3 %v1582_v22 }
  0x66   : > { %803 = vmatpush.bf16.msra.mxu2 %v1574_v4  ;;  %v1580_v4 = vld [vmem:[%s2424_s5 + $0x8] sm:$0xff] }
  0x69   : > { %647 = vmatpush.bf16.msrb.mxu1 %v1569_v12  ;;  %v448_v12 = vld [vmem:[%s1996_s25 + $0xf8] sm:$0xff]  ;;  %1603 = vmatpush.bf16.msra.mxu3 %v1581_v44 }
  0x6a   : > { %804 = vmatpush.bf16.msra.mxu2 %v1573_v7 }
  0x6d   : > { %648 = vmatpush.bf16.msrb.mxu1 %v1568_v13  ;;  %1604 = vmatpush.bf16.msra.mxu3 %v1580_v4 }
  0x6e   : > { %805 = vmatpush.bf16.msra.mxu2 %v1572_v8 }
  0x71   : > { %649 = vmatpush.bf16.msrb.mxu1 %v1567_v14  ;;  %v464_v14 = vpack.c.bf16 %v448_v12, %v446_v11 }
  0x72   : > { %806 = vmatpush.bf16.msra.mxu2 %v1571_v10 }
  0x74   : > { %630 = vmatmul.bf16.gmra.mxu1 %v459_v18  ;;  %610 = vmatmul.bf16.gmra.mxu0 %v451_v30 }
  0x75   : > { %650 = vmatpush.bf16.msrb.mxu1 %v1566_v17 }
  0x76   : > { %937 = vmatpush.bf16.msrb.mxu2 %v1582_v22 }
  0x79   : > { %651 = vmatpush.bf16.msrb.mxu1 %v1565_v19  ;;  %v2125_v19 = vld [vmem:[%s2422_s3] ss:$0 sm:$0xff] }
  0x7a   : > { %938 = vmatpush.bf16.msrb.mxu2 %v1581_v44 }
  0x7d   : > { %652 = vmatpush.bf16.msrb.mxu1 %v1564_v23 }
  0x7e   : > { %939 = vmatpush.bf16.msrb.mxu2 %v1580_v4 }
  0x81   : > { %653 = vmatpush.bf16.msrb.mxu1 %v1563_v24 }
  0x84   : > { %635 = vmatmul.bf16.gmra.mxu1 %v461_v27  ;;  %615 = vmatmul.bf16.gmra.mxu0 %v453_v36 }
  0x94   : > { %640 = vmatmul.bf16.gmra.mxu1 %v463_v33  ;;  %620 = vmatmul.bf16.gmra.mxu0 %v455_v42 }
  0xa4   : > { %654 = vmatmul.bf16.vlgmr.msrb.gmra.mxu1 %v450_v39 }
  0xb4   : > { %659 = vmatmul.bf16.gmra.mxu1 %v452_v45 }
  0xc4   : > { %664 = vmatmul.bf16.gmra.mxu1 %v454_v48 }
  0xd4   : > { %669 = vmatmul.bf16.gmra.mxu1 %v456_v51 }
  0xe1   : > { %v2076_v55 = vpop.f32.mrf.mxu1  ;;  %v606_v13 = vpop.f32.mrf.mxu0 }
  0xe2   : > { %v607_v21 = vadd.f32 %v2125_v19, %v606_v13 }
  0xe4   : > { %674 = vmatmul.bf16.gmra.mxu1 %v458_v54 }
  0xe9   : > { %v2078_v56 = vpop.f32.mrf.mxu1  ;;  %v608_v17 = vpop.f32.mrf.mxu0 }
  0xea   : > { %v609_v23 = vadd.f32 %v2125_v19, %v608_v17  ;;  %v629_v7 = vadd.f32 %v2125_v19, %v2078_v56 }
  0xf1   : > { %v2085_v61 = vpop.f32.mrf.mxu1  ;;  %v611_v20 = vpop.f32.mrf.mxu0 }
  0xf2   : > { %v612_v32 = vadd.f32 %v2125_v19, %v611_v20 }
  0xf4   : > { %679 = vmatmul.bf16.gmra.mxu1 %v460_v60 }
  0xf9   : > { %v2093_v0 = vpop.f32.mrf.mxu1  ;;  %v613_v29 = vpop.f32.mrf.mxu0 }
  0xfa   : > { %v614_v34 = vadd.f32 %v2125_v19, %v613_v29  ;;  %v634_v20 = vadd.f32 %v2125_v19, %v2093_v0 }
 0x101   : > { %v2103_v6 = vpop.f32.mrf.mxu1  ;;  %v616_v33 = vpop.f32.mrf.mxu0 }
 0x102   : > { %v617_v43 = vadd.f32 %v2125_v19, %v616_v33 }
 0x104   : > { %684 = vmatmul.bf16.gmra.mxu1 %v462_v5  ;;  %v627_v5 = vadd.f32 %v2125_v19, %v2076_v55 }
 0x109   : > { %v2111_v9 = vpop.f32.mrf.mxu1  ;;  %v618_v41 = vpop.f32.mrf.mxu0 }
 0x10a   : > { %v619_v45 = vadd.f32 %v2125_v19, %v618_v41  ;;  %v639_v0 = vadd.f32 %v2125_v19, %v2111_v9 }
 0x111   : > { %v2118_v15 = vpop.f32.mrf.mxu1  ;;  %v621_v49 = vpop.f32.mrf.mxu0 }
 0x112   : > { %v622_v54 = vadd.f32 %v2125_v19, %v621_v49 }
 0x114   : > { %689 = vmatmul.bf16.gmra.mxu1 %v464_v14 }
 0x119   : > { %v2120_v16 = vpop.f32.mrf.mxu1  ;;  %v623_v57 = vpop.f32.mrf.mxu0 }
 0x11a   : > { %v624_v58 = vadd.f32 %v2125_v19, %v623_v57 }
 0x121   : > { %v655_v18 = vpop.f32.mrf.mxu1 }
 0x122   : > { %v656_v24 = vadd.f32 %v655_v18, %v607_v21  ;;  %v632_v18 = vadd.f32 %v2125_v19, %v2085_v61  ;;  %v637_v61 = vadd.f32 %v2125_v19, %v2103_v6 }
 0x124   : > { %v695_v27 = vmax.f32 %v656_v24, 0.0 }
 0x129   : > { %v657_v25 = vpop.f32.mrf.mxu1 }
 0x12a   : > { %v658_v26 = vadd.f32 %v657_v25, %v609_v23  ;;  %v1579_v25 = vld [vmem:[%s2424_s5] sm:$0xff] }
 0x12b   : > { %940 = vmatpush.bf16.msrb.mxu2 %v1579_v25  ;;  %1605 = vmatpush.bf16.msra.mxu3 %v1579_v25  ;;  %v1521_v25 = vld [vmem:[%s2426_s7 + $0x38] sm:$0xf0] }
 0x12c   : > { %v696_v28 = vmax.f32 %v658_v26, 0.0 }
 0x12e   : > { %v711_v30 = vpack.c.bf16 %v696_v28, %v695_v27 }
 0x130   : > { %807 = vmatmul.bf16.vlgmr.msra.gmra.mxu2 %v711_v30 }
 0x131   : > { %v660_v31 = vpop.f32.mrf.mxu1 }
 0x132   : > { %v661_v35 = vadd.f32 %v660_v31, %v612_v32 }
 0x134   : > { %v697_v38 = vmax.f32 %v661_v35, 0.0  ;;  %v644_v35 = vadd.f32 %v2125_v19, %v2120_v16  ;;  %v736_v16 = vld [vmem:[%s2171_s28 + $0x8] sm:$0xff] }
 0x139   : > { %v662_v36 = vpop.f32.mrf.mxu1 }
 0x13a   : > { %v663_v37 = vadd.f32 %v662_v36, %v614_v34  ;;  %v642_v34 = vadd.f32 %v2125_v19, %v2118_v15  ;;  %v735_v15 = vld [vmem:[%s2171_s28] sm:$0xff] }
 0x13c   : > { %v698_v39 = vmax.f32 %v663_v37, 0.0 }
 0x13e   : > { %v712_v40 = vpack.c.bf16 %v698_v39, %v697_v38 }
 0x140   : > { %812 = vmatmul.bf16.gmra.mxu2 %v712_v40 }
 0x141   : > { %v665_v42 = vpop.f32.mrf.mxu1 }
 0x142   : > { %v666_v46 = vadd.f32 %v665_v42, %v617_v43 }
 0x144   : > { %v699_v50 = vmax.f32 %v666_v46, 0.0 }
 0x149   : > { %v667_v47 = vpop.f32.mrf.mxu1 }
 0x14a   : > { %v668_v48 = vadd.f32 %v667_v47, %v619_v45  ;;  %v737_v47 = vld [vmem:[%s2171_s28 + $0x10] sm:$0xff] }
 0x14c   : > { %v700_v51 = vmax.f32 %v668_v48, 0.0  ;;  %v738_v48 = vld [vmem:[%s2171_s28 + $0x18] sm:$0xff] }
 0x14e   : > { %v713_v52 = vpack.c.bf16 %v700_v51, %v699_v50 }
 0x150   : > { %817 = vmatmul.bf16.gmra.mxu2 %v713_v52 }
 0x151   : > { %v670_v53 = vpop.f32.mrf.mxu1 }
 0x152   : > { %v671_v59 = vadd.f32 %v670_v53, %v622_v54 }
 0x154   : > { %v701_v63 = vmax.f32 %v671_v59, 0.0  ;;  %v740_v59 = vld [vmem:[%s2171_s28 + $0x28] sm:$0xff] }
 0x159   : > { %v672_v60 = vpop.f32.mrf.mxu1 }
 0x15a   : > { %v673_v62 = vadd.f32 %v672_v60, %v624_v58  ;;  %v739_v58 = vld [vmem:[%s2171_s28 + $0x20] sm:$0xff] }
 0x15c   : > { %v702_v1 = vmax.f32 %v673_v62, 0.0 }
 0x15e   : > { %v714_v2 = vpack.c.bf16 %v702_v1, %v701_v63 }
 0x160   : > { %822 = vmatmul.bf16.gmra.mxu2 %v714_v2 }
 0x161   : > { %v675_v3 = vpop.f32.mrf.mxu1 }
 0x162   : > { %v676_v8 = vadd.f32 %v675_v3, %v627_v5  ;;  %v1519_v5 = vld [vmem:[%s2426_s7 + $0x30] sm:$0xf] }
 0x164   : > { %v703_v12 = vmax.f32 %v676_v8, 0.0  ;;  %v741_v8 = vld [vmem:[%s2171_s28 + $0x30] sm:$0xff] }
 0x169   : > { %v677_v10 = vpop.f32.mrf.mxu1 }
 0x16a   : > { %v678_v11 = vadd.f32 %v677_v10, %v629_v7  ;;  %v1590_v7 = vld [vmem:[%s2426_s7 + $0x34] sm:$0xf0] }
 0x16b   : > { %v1520_v10 = vor.u32 %v1590_v7, %v1519_v5 }
 0x16c   : > { %v704_v13 = vmax.f32 %v678_v11, 0.0  ;;  %v742_v11 = vld [vmem:[%s2171_s28 + $0x38] sm:$0xff] }
 0x16d   : > { %1088 = vmatpush.bf16.msrb.mxu3 %v1520_v10 }
 0x16e   : > { %v715_v14 = vpack.c.bf16 %v704_v13, %v703_v12 }
 0x170   : > { %827 = vmatmul.bf16.gmra.mxu2 %v715_v14 }
 0x171   : > { %v680_v17 = vpop.f32.mrf.mxu1 }
 0x172   : > { %v681_v55 = vadd.f32 %v680_v17, %v632_v18 }
 0x174   : > { %v705_v23 = vmax.f32 %v681_v55, 0.0 }
 0x179   : > { %v682_v21 = vpop.f32.mrf.mxu1 }
 0x17a   : > { %v683_v22 = vadd.f32 %v682_v21, %v634_v20  ;;  %v1511_v21 = vld [vmem:[%s2426_s7 + $0x20] sm:$0xf] }
 0x17c   : > { %v706_v24 = vmax.f32 %v683_v22, 0.0  ;;  %v1588_v22 = vld [vmem:[%s2426_s7 + $0x24] sm:$0xf0] }
 0x17e   : > { %v716_v56 = vpack.c.bf16 %v706_v24, %v705_v23  ;;  %v743_v23 = vld [vmem:[%s2171_s28 + $0x40] sm:$0xff]  ;;  %v1512_v24 = vor.u32 %v1588_v22, %v1511_v21 }
 0x180   : > { %832 = vmatmul.bf16.gmra.mxu2 %v716_v56  ;;  %v1589_v56 = vld [vmem:[%s2426_s7 + $0x34] sm:$0xf]  ;;  %1089 = vmatpush.bf16.msrb.mxu3 %v1512_v24 }
 0x181   : > { %v685_v26 = vpop.f32.mrf.mxu1 }
 0x182   : > { %v686_v27 = vadd.f32 %v685_v26, %v637_v61  ;;  %v1524_v26 = vor.u32 %v1589_v56, %v1521_v25  ;;  %v744_v61 = vld [vmem:[%s2171_s28 + $0x48] sm:$0xff] }
 0x184   : > { %v707_v30 = vmax.f32 %v686_v27, 0.0  ;;  %1137 = vmatpush.bf16.msrb.mxu0 %v1524_v26 }
 0x189   : > { %v687_v28 = vpop.f32.mrf.mxu1 }
 0x18a   : > { %v688_v29 = vadd.f32 %v687_v28, %v639_v0 }
 0x18c   : > { %v708_v31 = vmax.f32 %v688_v29, 0.0 }
 0x18e   : > { %v717_v32 = vpack.c.bf16 %v708_v31, %v707_v30 }
 0x190   : > { %837 = vmatmul.bf16.gmra.mxu2 %v717_v32 }
 0x191   : > { %v690_v33 = vpop.f32.mrf.mxu1 }
 0x192   : > { %v691_v36 = vadd.f32 %v690_v33, %v642_v34  ;;  %v1587_v33 = vld [vmem:[%s2426_s7 + $0x24] sm:$0xf]  ;;  %v1513_v34 = vld [vmem:[%s2426_s7 + $0x28] sm:$0xf0] }
 0x194   : > { %v709_v38 = vmax.f32 %v691_v36, 0.0  ;;  %v1516_v36 = vor.u32 %v1587_v33, %v1513_v34 }
 0x196   : > { %1138 = vmatpush.bf16.msrb.mxu0 %v1516_v36 }
 0x199   : > { %v692_v6 = vpop.f32.mrf.mxu1 }
 0x19a   : > { %v693_v37 = vadd.f32 %v692_v6, %v644_v35  ;;  %v745_v35 = vld [vmem:[%s2171_s28 + $0x50] sm:$0xff]  ;;  %v746_v6 = vld [vmem:[%s2171_s28 + $0x58] sm:$0xff] }
 0x19c   : > { %v710_v9 = vmax.f32 %v693_v37, 0.0 }
 0x19e   : > { %v718_v39 = vpack.c.bf16 %v710_v9, %v709_v38 }
 0x1a0   : > { %842 = vmatmul.bf16.gmra.mxu2 %v718_v39 }
 0x1b3   : > { %v808_v40 = vpop.f32.mrf.mxu2 }
 0x1b4   : > { %v809_v19 = vadd.f32 %v808_v40, %v735_v15 }
 0x1b6   : > { %v848_v43 = vmax.f32 %v809_v19, 0.0  ;;  %v1586_v19 = vld [vmem:[%s2426_s7 + $0x14] sm:$0xf0] }
 0x1bb   : > { %v810_v41 = vpop.f32.mrf.mxu2 }
 0x1bc   : > { %v811_v42 = vadd.f32 %v810_v41, %v736_v16  ;;  %v1503_v16 = vld [vmem:[%s2426_s7 + $0x10] sm:$0xf] }
 0x1bd   : > { %v1504_v41 = vor.u32 %v1586_v19, %v1503_v16 }
 0x1be   : > { %v849_v44 = vmax.f32 %v811_v42, 0.0  ;;  %v1585_v42 = vld [vmem:[%s2426_s7 + $0x14] sm:$0xf] }
 0x1bf   : > { %1090 = vmatpush.bf16.msrb.mxu3 %v1504_v41 }
 0x1c0   : > { %v864_v45 = vpack.c.bf16 %v849_v44, %v848_v43  ;;  %v1505_v43 = vld [vmem:[%s2426_s7 + $0x18] sm:$0xf0]  ;;  %v1495_v44 = vld [vmem:[%s2426_s7] sm:$0xf] }
 0x1c2   : > { %1485 = vmatmul.msk.bf16.vlgmr.msrb.gmra.mxu2 %vm908_vm0, %v864_v45 }
 0x1c3   : > { %v813_v46 = vpop.f32.mrf.mxu2 }
 0x1c4   : > { %v814_v49 = vadd.f32 %v813_v46, %v737_v47  ;;  %v1508_v46 = vor.u32 %v1585_v42, %v1505_v43  ;;  %v1584_v47 = vld [vmem:[%s2426_s7 + $0x4] sm:$0xf0] }
 0x1c6   : > { %v850_v52 = vmax.f32 %v814_v49, 0.0  ;;  %1139 = vmatpush.bf16.msrb.mxu0 %v1508_v46  ;;  %v747_v49 = vld [vmem:[%s2171_s28 + $0x60] sm:$0xff] }
 0x1cb   : > { %v815_v50 = vpop.f32.mrf.mxu2 }
 0x1cc   : > { %v816_v51 = vadd.f32 %v815_v50, %v738_v48  ;;  %v1496_v48 = vor.u32 %v1584_v47, %v1495_v44  ;;  %v748_v50 = vld [vmem:[%s2171_s28 + $0x68] sm:$0xff] }
 0x1ce   : > { %v851_v53 = vmax.f32 %v816_v51, 0.0  ;;  %1091 = vmatpush.bf16.msrb.mxu3 %v1496_v48 }
 0x1d0   : > { %v865_v54 = vpack.c.bf16 %v851_v53, %v850_v52 }
 0x1d2   : > { %1486 = vmatmul.msk.bf16.gmra.mxu2 %vm908_vm0, %v865_v54 }
 0x1d3   : > { %v818_v57 = vpop.f32.mrf.mxu2 }
 0x1d4   : > { %v819_v60 = vadd.f32 %v818_v57, %v739_v58 }
 0x1d6   : > { %v852_v1 = vmax.f32 %v819_v60, 0.0  ;;  %v749_v60 = vld [vmem:[%s2171_s28 + $0x70] sm:$0xff] }
 0x1db   : > { %v820_v62 = vpop.f32.mrf.mxu2 }
 0x1dc   : > { %v821_v63 = vadd.f32 %v820_v62, %v740_v59  ;;  %v1583_v62 = vld [vmem:[%s2426_s7 + $0x4] sm:$0xf] }
 0x1de   : > { %v853_v2 = vmax.f32 %v821_v63, 0.0  ;;  %v1497_v63 = vld [vmem:[%s2426_s7 + $0x8] sm:$0xf0] }
 0x1e0   : > { %v866_v3 = vpack.c.bf16 %v853_v2, %v852_v1  ;;  %v750_v1 = vld [vmem:[%s2171_s28 + $0x78] sm:$0xff]  ;;  %v1500_v2 = vor.u32 %v1583_v62, %v1497_v63 }
 0x1e2   : > { %1487 = vmatmul.msk.bf16.gmra.mxu2 %vm908_vm0, %v866_v3  ;;  %1140 = vmatpush.bf16.msrb.mxu0 %v1500_v2  ;;  %v1014_v2 = vld [vmem:[%s2427_s8] sm:$0x3] }
 0x1e3   : > { %v823_v4 = vpop.f32.mrf.mxu2 }
 0x1e4   : > { %v824_v12 = vadd.f32 %v823_v4, %v741_v8 }
 0x1e6   : > { %v854_v17 = vmax.f32 %v824_v12, 0.0  ;;  %v2248_v12 = vld [vmem:[%s2425_s6] ss:$0 sm:$0xff] }
 0x1eb   : > { %v825_v13 = vpop.f32.mrf.mxu2 }
 0x1ec   : > { %v826_v14 = vadd.f32 %v825_v13, %v742_v11 }
 0x1ee   : > { %v855_v18 = vmax.f32 %v826_v14, 0.0 }
 0x1f0   : > { %v867_v20 = vpack.c.bf16 %v855_v18, %v854_v17 }
 0x1f2   : > { %1488 = vmatmul.msk.bf16.vlgmr.msra.gmra.mxu3 %vm908_vm0, %v867_v20 }
 0x1f3   : > { %v828_v55 = vpop.f32.mrf.mxu2 }
 0x1f4   : > { %v829_v0 = vadd.f32 %v828_v55, %v743_v23 }
 0x1f6   : > { %v856_v29 = vmax.f32 %v829_v0, 0.0 }
 0x1fb   : > { %v830_v27 = vpop.f32.mrf.mxu2 }
 0x1fc   : > { %v831_v28 = vadd.f32 %v830_v27, %v744_v61 }
 0x1fe   : > { %v857_v30 = vmax.f32 %v831_v28, 0.0 }
 0x200   : > { %v868_v31 = vpack.c.bf16 %v857_v30, %v856_v29 }
 0x202   : > { %1489 = vmatmul.msk.bf16.gmra.mxu3 %vm908_vm0, %v868_v31 }
 0x203   : > { %v833_v32 = vpop.f32.mrf.mxu2 }
 0x204   : > { %v834_v37 = vadd.f32 %v833_v32, %v745_v35 }
 0x206   : > { %v858_v39 = vmax.f32 %v834_v37, 0.0 }
 0x20b   : > { %v835_v38 = vpop.f32.mrf.mxu2 }
 0x20c   : > { %v836_v9 = vadd.f32 %v835_v38, %v746_v6 }
 0x20e   : > { %v859_v40 = vmax.f32 %v836_v9, 0.0 }
 0x210   : > { %v869_v15 = vpack.c.bf16 %v859_v40, %v858_v39 }
 0x212   : > { %1490 = vmatmul.msk.bf16.gmra.mxu3 %vm908_vm0, %v869_v15 }
 0x213   : > { %v838_v45 = vpop.f32.mrf.mxu2 }
 0x214   : > { %v839_v51 = vadd.f32 %v838_v45, %v747_v49 }
 0x216   : > { %v860_v54 = vmax.f32 %v839_v51, 0.0 }
 0x21b   : > { %v840_v52 = vpop.f32.mrf.mxu2 }
 0x21c   : > { %v841_v53 = vadd.f32 %v840_v52, %v748_v50 }
 0x21e   : > { %v861_v57 = vmax.f32 %v841_v53, 0.0 }
 0x220   : > { %v870_v58 = vpack.c.bf16 %v861_v57, %v860_v54 }
 0x222   : > { %1491 = vmatmul.msk.bf16.gmra.mxu3 %vm908_vm0, %v870_v58 }
 0x223   : > { %v843_v59 = vpop.f32.mrf.mxu2 }
 0x224   : > { %v844_v3 = vadd.f32 %v843_v59, %v749_v60 }
 0x226   : > { %v862_v7 = vmax.f32 %v844_v3, 0.0  ;;  %v2285_v3 = vperm.slane %v1014_v2, 1 }
 0x22b   : > { %v845_v4 = vpop.f32.mrf.mxu2 }
 0x22c   : > { %v846_v5 = vadd.f32 %v845_v4, %v750_v1 }
 0x22e   : > { %v863_v8 = vmax.f32 %v846_v5, 0.0 }
 0x230   : > { %v871_v10 = vpack.c.bf16 %v863_v8, %v862_v7  ;;  %v2288_v7 = vperm.slane %v1014_v2, 0 }
 0x232   : > { %1492 = vmatmul.msk.bf16.gmra.mxu3 %vm908_vm0, %v871_v10 }
 0x245   : > { %v942_v11 = vpop.f32.mrf.mxu2 }
 0x246   : > { %v943_v13 = vadd.f32 %v2248_v12, %v942_v11 }
 0x248   : > { %v982_v18 = vmax.f32 %v943_v13, 0.0 }
 0x24d   : > { %v944_v14 = vpop.f32.mrf.mxu2 }
 0x24e   : > { %v945_v17 = vadd.f32 %v2248_v12, %v944_v14 }
 0x250   : > { %v983_v20 = vmax.f32 %v945_v17, 0.0 }
 0x252   : > { %v998_v55 = vpack.c.bf16 %v983_v20, %v982_v18 }
 0x254   : > { %1525 = vmatmul.msk.bf16.vlgmr.msrb.gmra.mxu3 %vm908_vm0, %v998_v55  ;;  %1533 = vmatmul.msk.bf16.vlgmr.msrb.gmra.mxu0 %vm908_vm0, %v998_v55 }
 0x255   : > { %v947_v21 = vpop.f32.mrf.mxu2 }
 0x256   : > { %v948_v22 = vadd.f32 %v2248_v12, %v947_v21 }
 0x258   : > { %v984_v56 = vmax.f32 %v948_v22, 0.0 }
 0x25d   : > { %v949_v23 = vpop.f32.mrf.mxu2 }
 0x25e   : > { %v950_v24 = vadd.f32 %v2248_v12, %v949_v23 }
 0x260   : > { %v985_v25 = vmax.f32 %v950_v24, 0.0 }
 0x262   : > { %v999_v26 = vpack.c.bf16 %v985_v25, %v984_v56 }
 0x264   : > { %1526 = vmatmul.msk.bf16.gmra.mxu3 %vm908_vm0, %v999_v26  ;;  %1534 = vmatmul.msk.bf16.gmra.mxu0 %vm908_vm0, %v999_v26 }
 0x265   : > { %v952_v61 = vpop.f32.mrf.mxu2 }
 0x266   : > { %v953_v0 = vadd.f32 %v2248_v12, %v952_v61 }
 0x268   : > { %v986_v29 = vmax.f32 %v953_v0, 0.0 }
 0x26d   : > { %v954_v27 = vpop.f32.mrf.mxu2 }
 0x26e   : > { %v955_v28 = vadd.f32 %v2248_v12, %v954_v27 }
 0x270   : > { %v987_v30 = vmax.f32 %v955_v28, 0.0 }
 0x272   : > { %v1000_v31 = vpack.c.bf16 %v987_v30, %v986_v29 }
 0x274   : > { %1527 = vmatmul.msk.bf16.gmra.mxu3 %vm908_vm0, %v1000_v31  ;;  %1535 = vmatmul.msk.bf16.gmra.mxu0 %vm908_vm0, %v1000_v31 }
 0x275   : > { %v957_v32 = vpop.f32.mrf.mxu3 }
 0x276   : > { %v958_v33 = vadd.f32 %v2248_v12, %v957_v32 }
 0x278   : > { %v988_v36 = vmax.f32 %v958_v33, 0.0 }
 0x27d   : > { %v959_v34 = vpop.f32.mrf.mxu3 }
 0x27e   : > { %v960_v35 = vadd.f32 %v2248_v12, %v959_v34 }
 0x280   : > { %v989_v6 = vmax.f32 %v960_v35, 0.0 }
 0x282   : > { %v1001_v37 = vpack.c.bf16 %v989_v6, %v988_v36 }
 0x284   : > { %1528 = vmatmul.msk.bf16.gmra.mxu3 %vm908_vm0, %v1001_v37  ;;  %1536 = vmatmul.msk.bf16.gmra.mxu0 %vm908_vm0, %v1001_v37 }
 0x285   : > { %v962_v38 = vpop.f32.mrf.mxu3 }
 0x286   : > { %v963_v9 = vadd.f32 %v2248_v12, %v962_v38 }
 0x288   : > { %v990_v15 = vmax.f32 %v963_v9, 0.0 }
 0x28d   : > { %v964_v39 = vpop.f32.mrf.mxu3 }
 0x28e   : > { %v965_v40 = vadd.f32 %v2248_v12, %v964_v39 }
 0x290   : > { %v991_v16 = vmax.f32 %v965_v40, 0.0 }
 0x292   : > { %v1002_v19 = vpack.c.bf16 %v991_v16, %v990_v15 }
 0x294   : > { %1529 = vmatmul.msk.bf16.gmra.mxu3 %vm908_vm0, %v1002_v19  ;;  %1537 = vmatmul.msk.bf16.gmra.mxu0 %vm908_vm0, %v1002_v19 }
 0x295   : > { %v967_v41 = vpop.f32.mrf.mxu3 }
 0x296   : > { %v968_v42 = vadd.f32 %v2248_v12, %v967_v41 }
 0x298   : > { %v992_v45 = vmax.f32 %v968_v42, 0.0 }
 0x29d   : > { %v969_v43 = vpop.f32.mrf.mxu3 }
 0x29e   : > { %v970_v44 = vadd.f32 %v2248_v12, %v969_v43 }
 0x2a0   : > { %v993_v46 = vmax.f32 %v970_v44, 0.0 }
 0x2a2   : > { %v1003_v47 = vpack.c.bf16 %v993_v46, %v992_v45 }
 0x2a4   : > { %1530 = vmatmul.msk.bf16.gmra.mxu3 %vm908_vm0, %v1003_v47  ;;  %1538 = vmatmul.msk.bf16.gmra.mxu0 %vm908_vm0, %v1003_v47 }
 0x2a5   : > { %v972_v48 = vpop.f32.mrf.mxu3 }
 0x2a6   : > { %v973_v49 = vadd.f32 %v2248_v12, %v972_v48 }
 0x2a8   : > { %v994_v52 = vmax.f32 %v973_v49, 0.0 }
 0x2ad   : > { %v974_v50 = vpop.f32.mrf.mxu3 }
 0x2ae   : > { %v975_v51 = vadd.f32 %v2248_v12, %v974_v50 }
 0x2b0   : > { %v995_v53 = vmax.f32 %v975_v51, 0.0 }
 0x2b2   : > { %v1004_v54 = vpack.c.bf16 %v995_v53, %v994_v52 }
 0x2b4   : > { %1531 = vmatmul.msk.bf16.gmra.mxu3 %vm908_vm0, %v1004_v54  ;;  %1539 = vmatmul.msk.bf16.gmra.mxu0 %vm908_vm0, %v1004_v54 }
 0x2b5   : > { %v977_v57 = vpop.f32.mrf.mxu3 }
 0x2b6   : > { %v978_v58 = vadd.f32 %v2248_v12, %v977_v57 }
 0x2b8   : > { %v996_v62 = vmax.f32 %v978_v58, 0.0 }
 0x2bd   : > { %v979_v59 = vpop.f32.mrf.mxu3 }
 0x2be   : > { %v980_v60 = vadd.f32 %v2248_v12, %v979_v59 }
 0x2c0   : > { %v997_v63 = vmax.f32 %v980_v60, 0.0 }
 0x2c2   : > { %v1005_v1 = vpack.c.bf16 %v997_v63, %v996_v62 }
 0x2c4   : > { %1532 = vmatmul.msk.bf16.gmra.mxu3 %vm908_vm0, %v1005_v1  ;;  %1540 = vmatmul.msk.bf16.gmra.mxu0 %vm908_vm0, %v1005_v1 }
 0x2d1   : > { %v1142_v4 = vpop.f32.mrf.mxu0 }
 0x2d2   : > { %v1143_v5 = vadd.f32 %v1142_v4, %v2285_v3 }
 0x2d4   : > { %1651 = vtanh.f32 %v1143_v5 }
 0x2d7   : > { %v1093_v8 = vpop.f32.mrf.mxu3 }
 0x2d8   : > { %v1094_v10 = vadd.f32 %v1093_v8, %v2288_v7 }
 0x2d9   : > { %v1144_v11 = vpop.f32.mrf.mxu0 }
 0x2da   : > { %v1652_v12 = vpop.eup %1651  ;;  %1653 = vtanh.f32 %v1094_v10  ;;  %v1145_v13 = vadd.f32 %v1144_v11, %v2285_v3 }
 0x2db   : > { %1215 = vst [vmem:[%s2294_s27 + $0x8] sm:$0xff] %v1652_v12 }
 0x2dc   : > { %1655 = vtanh.f32 %v1145_v13 }
 0x2df   : > { %v1095_v14 = vpop.f32.mrf.mxu3 }
 0x2e0   : > { %v1654_v17 = vpop.eup %1653  ;;  %v1096_v18 = vadd.f32 %v1095_v14, %v2288_v7 }
 0x2e1   : > { %1214 = vst [vmem:[%s2294_s27] sm:$0xff] %v1654_v17  ;;  %v1147_v20 = vpop.f32.mrf.mxu0 }
 0x2e2   : > { %v1656_v55 = vpop.eup %1655  ;;  %1657 = vtanh.f32 %v1096_v18  ;;  %v1148_v21 = vadd.f32 %v1147_v20, %v2285_v3 }
 0x2e3   : > { %1217 = vst [vmem:[%s2294_s27 + $0x18] sm:$0xff] %v1656_v55 }
 0x2e4   : > { %1659 = vtanh.f32 %v1148_v21 }
 0x2e7   : > { %v1098_v22 = vpop.f32.mrf.mxu3 }
 0x2e8   : > { %v1658_v23 = vpop.eup %1657  ;;  %v1099_v24 = vadd.f32 %v1098_v22, %v2288_v7 }
 0x2e9   : > { %1216 = vst [vmem:[%s2294_s27 + $0x10] sm:$0xff] %v1658_v23  ;;  %v1149_v56 = vpop.f32.mrf.mxu0 }
 0x2ea   : > { %v1660_v25 = vpop.eup %1659  ;;  %1661 = vtanh.f32 %v1099_v24  ;;  %v1150_v26 = vadd.f32 %v1149_v56, %v2285_v3 }
 0x2eb   : > { %1219 = vst [vmem:[%s2294_s27 + $0x28] sm:$0xff] %v1660_v25 }
 0x2ec   : > { %1663 = vtanh.f32 %v1150_v26 }
 0x2ef   : > { %v1100_v61 = vpop.f32.mrf.mxu3 }
 0x2f0   : > { %v1662_v0 = vpop.eup %1661  ;;  %v1101_v27 = vadd.f32 %v1100_v61, %v2288_v7 }
 0x2f1   : > { %1218 = vst [vmem:[%s2294_s27 + $0x20] sm:$0xff] %v1662_v0  ;;  %v1152_v28 = vpop.f32.mrf.mxu0 }
 0x2f2   : > { %v1664_v29 = vpop.eup %1663  ;;  %1665 = vtanh.f32 %v1101_v27  ;;  %v1153_v30 = vadd.f32 %v1152_v28, %v2285_v3 }
 0x2f3   : > { %1221 = vst [vmem:[%s2294_s27 + $0x38] sm:$0xff] %v1664_v29 }
 0x2f4   : > { %1667 = vtanh.f32 %v1153_v30 }
 0x2f7   : > { %v1103_v31 = vpop.f32.mrf.mxu3 }
 0x2f8   : > { %v1666_v32 = vpop.eup %1665  ;;  %v1104_v33 = vadd.f32 %v1103_v31, %v2288_v7 }
 0x2f9   : > { %1220 = vst [vmem:[%s2294_s27 + $0x30] sm:$0xff] %v1666_v32  ;;  %v1154_v34 = vpop.f32.mrf.mxu0 }
 0x2fa   : > { %v1668_v35 = vpop.eup %1667  ;;  %1669 = vtanh.f32 %v1104_v33  ;;  %v1155_v36 = vadd.f32 %v1154_v34, %v2285_v3 }
 0x2fb   : > { %1223 = vst [vmem:[%s2294_s27 + $0x48] sm:$0xff] %v1668_v35 }
 0x2fc   : > { %1671 = vtanh.f32 %v1155_v36 }
 0x2ff   : > { %v1105_v6 = vpop.f32.mrf.mxu3 }
 0x300   : > { %v1670_v37 = vpop.eup %1669  ;;  %v1106_v38 = vadd.f32 %v1105_v6, %v2288_v7 }
 0x301   : > { %1222 = vst [vmem:[%s2294_s27 + $0x40] sm:$0xff] %v1670_v37  ;;  %v1157_v9 = vpop.f32.mrf.mxu0 }
 0x302   : > { %v1672_v39 = vpop.eup %1671  ;;  %1673 = vtanh.f32 %v1106_v38  ;;  %v1158_v40 = vadd.f32 %v1157_v9, %v2285_v3 }
 0x303   : > { %1225 = vst [vmem:[%s2294_s27 + $0x58] sm:$0xff] %v1672_v39 }
 0x304   : > { %1675 = vtanh.f32 %v1158_v40 }
 0x307   : > { %v1108_v15 = vpop.f32.mrf.mxu3 }
 0x308   : > { %v1674_v16 = vpop.eup %1673  ;;  %v1109_v19 = vadd.f32 %v1108_v15, %v2288_v7 }
 0x309   : > { %1224 = vst [vmem:[%s2294_s27 + $0x50] sm:$0xff] %v1674_v16  ;;  %v1159_v41 = vpop.f32.mrf.mxu0 }
 0x30a   : > { %v1676_v42 = vpop.eup %1675  ;;  %1677 = vtanh.f32 %v1109_v19  ;;  %v1160_v43 = vadd.f32 %v1159_v41, %v2285_v3 }
 0x30b   : > { %1227 = vst [vmem:[%s2294_s27 + $0x68] sm:$0xff] %v1676_v42 }
 0x30c   : > { %1679 = vtanh.f32 %v1160_v43 }
 0x30f   : > { %v1110_v44 = vpop.f32.mrf.mxu3 }
 0x310   : > { %v1678_v45 = vpop.eup %1677  ;;  %v1111_v46 = vadd.f32 %v1110_v44, %v2288_v7 }
 0x311   : > { %1226 = vst [vmem:[%s2294_s27 + $0x60] sm:$0xff] %v1678_v45  ;;  %v1162_v47 = vpop.f32.mrf.mxu0 }
 0x312   : > { %v1680_v48 = vpop.eup %1679  ;;  %1681 = vtanh.f32 %v1111_v46  ;;  %v1163_v49 = vadd.f32 %v1162_v47, %v2285_v3 }
 0x313   : > { %1229 = vst [vmem:[%s2294_s27 + $0x78] sm:$0xff] %v1680_v48 }
 0x314   : > { %1683 = vtanh.f32 %v1163_v49 }
 0x317   : > { %v1113_v50 = vpop.f32.mrf.mxu3 }
 0x318   : > { %v1682_v51 = vpop.eup %1681  ;;  %v1114_v52 = vadd.f32 %v1113_v50, %v2288_v7 }
 0x319   : > { %1228 = vst [vmem:[%s2294_s27 + $0x70] sm:$0xff] %v1682_v51  ;;  %v1164_v53 = vpop.f32.mrf.mxu0 }
 0x31a   : > { %v1684_v54 = vpop.eup %1683  ;;  %1685 = vtanh.f32 %v1114_v52  ;;  %v1165_v57 = vadd.f32 %v1164_v53, %v2285_v3 }
 0x31b   : > { %1231 = vst [vmem:[%s2294_s27 + $0x88] sm:$0xff] %v1684_v54 }
 0x31c   : > { %1687 = vtanh.f32 %v1165_v57 }
 0x31f   : > { %v1115_v58 = vpop.f32.mrf.mxu3 }
 0x320   : > { %v1686_v59 = vpop.eup %1685  ;;  %v1116_v60 = vadd.f32 %v1115_v58, %v2288_v7 }
 0x321   : > { %1230 = vst [vmem:[%s2294_s27 + $0x80] sm:$0xff] %v1686_v59  ;;  %v1167_v62 = vpop.f32.mrf.mxu0 }
 0x322   : > { %v1688_v63 = vpop.eup %1687  ;;  %1689 = vtanh.f32 %v1116_v60  ;;  %v1168_v1 = vadd.f32 %v1167_v62, %v2285_v3 }
 0x323   : > { %1233 = vst [vmem:[%s2294_s27 + $0x98] sm:$0xff] %v1688_v63 }
 0x324   : > { %1691 = vtanh.f32 %v1168_v1 }
 0x327   : > { %v1118_v2 = vpop.f32.mrf.mxu3 }
 0x328   : > { %v1690_v4 = vpop.eup %1689  ;;  %v1119_v5 = vadd.f32 %v1118_v2, %v2288_v7 }
 0x329   : > { %1232 = vst [vmem:[%s2294_s27 + $0x90] sm:$0xff] %v1690_v4  ;;  %v1169_v8 = vpop.f32.mrf.mxu0 }
 0x32a   : > { %v1692_v10 = vpop.eup %1691  ;;  %1693 = vtanh.f32 %v1119_v5  ;;  %v1170_v11 = vadd.f32 %v1169_v8, %v2285_v3 }
 0x32b   : > { %1235 = vst [vmem:[%s2294_s27 + $0xa8] sm:$0xff] %v1692_v10 }
 0x32c   : > { %1695 = vtanh.f32 %v1170_v11 }
 0x32f   : > { %v1120_v12 = vpop.f32.mrf.mxu3 }
 0x330   : > { %v1694_v13 = vpop.eup %1693  ;;  %v1121_v14 = vadd.f32 %v1120_v12, %v2288_v7 }
 0x331   : > { %1234 = vst [vmem:[%s2294_s27 + $0xa0] sm:$0xff] %v1694_v13  ;;  %v1172_v17 = vpop.f32.mrf.mxu0 }
 0x332   : > { %v1696_v18 = vpop.eup %1695  ;;  %1697 = vtanh.f32 %v1121_v14  ;;  %v1173_v20 = vadd.f32 %v1172_v17, %v2285_v3 }
 0x333   : > { %1237 = vst [vmem:[%s2294_s27 + $0xb8] sm:$0xff] %v1696_v18 }
 0x334   : > { %1699 = vtanh.f32 %v1173_v20 }
 0x337   : > { %v1123_v55 = vpop.f32.mrf.mxu3 }
 0x338   : > { %v1698_v21 = vpop.eup %1697  ;;  %v1124_v22 = vadd.f32 %v1123_v55, %v2288_v7 }
 0x339   : > { %1236 = vst [vmem:[%s2294_s27 + $0xb0] sm:$0xff] %v1698_v21  ;;  %v1174_v23 = vpop.f32.mrf.mxu0 }
 0x33a   : > { %v1700_v24 = vpop.eup %1699  ;;  %1701 = vtanh.f32 %v1124_v22  ;;  %v1175_v56 = vadd.f32 %v1174_v23, %v2285_v3 }
 0x33b   : > { %1239 = vst [vmem:[%s2294_s27 + $0xc8] sm:$0xff] %v1700_v24 }
 0x33c   : > { %1703 = vtanh.f32 %v1175_v56 }
 0x33f   : > { %v1125_v25 = vpop.f32.mrf.mxu3 }
 0x340   : > { %v1702_v26 = vpop.eup %1701  ;;  %v1126_v61 = vadd.f32 %v1125_v25, %v2288_v7 }
 0x341   : > { %1238 = vst [vmem:[%s2294_s27 + $0xc0] sm:$0xff] %v1702_v26  ;;  %v1177_v0 = vpop.f32.mrf.mxu0 }
 0x342   : > { %v1704_v27 = vpop.eup %1703  ;;  %1705 = vtanh.f32 %v1126_v61  ;;  %v1178_v28 = vadd.f32 %v1177_v0, %v2285_v3 }
 0x343   : > { %1241 = vst [vmem:[%s2294_s27 + $0xd8] sm:$0xff] %v1704_v27 }
 0x344   : > { %1707 = vtanh.f32 %v1178_v28 }
 0x347   : > { %v1128_v29 = vpop.f32.mrf.mxu3 }
 0x348   : > { %v1706_v30 = vpop.eup %1705  ;;  %v1129_v31 = vadd.f32 %v1128_v29, %v2288_v7 }
 0x349   : > { %1240 = vst [vmem:[%s2294_s27 + $0xd0] sm:$0xff] %v1706_v30  ;;  %v1179_v32 = vpop.f32.mrf.mxu0 }
 0x34a   : > { %v1708_v33 = vpop.eup %1707  ;;  %1709 = vtanh.f32 %v1129_v31  ;;  %v1180_v34 = vadd.f32 %v1179_v32, %v2285_v3 }
 0x34b   : > { %1243 = vst [vmem:[%s2294_s27 + $0xe8] sm:$0xff] %v1708_v33 }
 0x34c   : > { %1711 = vtanh.f32 %v1180_v34 }
 0x34f   : > { %v1130_v35 = vpop.f32.mrf.mxu3 }
 0x350   : > { %v1710_v36 = vpop.eup %1709  ;;  %v1131_v6 = vadd.f32 %v1130_v35, %v2288_v7 }
 0x351   : > { %1242 = vst [vmem:[%s2294_s27 + $0xe0] sm:$0xff] %v1710_v36 }
 0x352   : > { %v1712_v37 = vpop.eup %1711  ;;  %1713 = vtanh.f32 %v1131_v6 }
 0x353   : > { %1245 = vst [vmem:[%s2294_s27 + $0xf8] sm:$0xff] %v1712_v37 }
 0x355   : > { %1253 = sbr.rel (!%p1933_p9) target bundleno = 889 (0x379), region = 64 }
 0x358   : > { %v1714_v38 = vpop.eup %1713 }
 0x359   : > { %1244 = vst [vmem:[%s2294_s27 + $0xf0] sm:$0xff] %v1714_v38 }
 0x35a   : > { %s2453_s14 = smov (!%p1256_p13, %s1255_s14), 16 }
 0x35b   : > { %s1591_s25 = sshll.u32 %s2453_s14, 4 }
 0x35c   : > { %s1260_s16 = ssub.s32 256, %s1591_s25 }
 0x35d   : > { %s1261_s15 = sshll.u32 %s1260_s16, 4 }
 0x35e   : > { %1262 = vsyncadd %s1247_s24, %s1261_s15  ;;  %p2366_p5 = scmp.ne.s32.totalorder %s1591_s25, 0  ;;  %s1593_s20 = sshll.u32 %s1910_s13, 8 }
 0x35f   : > { %s1266_s26 = scalar_lea.hbm %s2428_s9, %s1593_s20  ;;  %s1268_s23 = sshll.u32 %s2294_s27, 4  ;;  %s2375_s23 = int_to_ptr.vmem [resolvable:$true] %s1268_s23 }
 0x360   : > { %s1270_s19 = sshll.u32 %s1266_s26, 4  ;;  %s1549_s18 = sshll.u32 %s2453_s14, 8  ;;  %s2377_s19 = int_to_ptr.hbm [resolvable:$true] %s1270_s19 }
 0x361   : > { %s1754_s28 = sshra.s32 %s2375_s23, 4  ;;  %s1756_s17 = sshrl.u32 %s1549_s18, 4  ;;  %s1755_s28 = int_to_ptr.vmem [resolvable:$true] %s1754_s28 }
 0x362   : > { %s1761_s25 = scalar_lea.vmem %s1755_s28, %s1756_s17  ;;  %s1836_s13 = smov [#allocation5]  }
 0x363   : > { %p1762_p9 = scmp.ne.s32.totalorder %s1755_s28, %s1761_s25  ;;  %s1765_s16 = scalar_lea.vmem %s1836_s13, 512 }
 0x364   : > { %p1767_p11 = scmp.lt.s32.totalorder %s1765_s16, %s1761_s25 }
 0x365   : > { %p1763_p7 = pnand %p1762_p9, %p2366_p5 }
 0x367   : > { %p1764_p8 = pneg %p1763_p7 }
 0x369   : > { %p1769_p12 = pnand %p1767_p11, %p1764_p8 }
 0x36b   : > { %1772 = shalt.err (!%p1769_p12)
}
 0x36c   : > { %s1773_s27 = sshra.s32 %s2377_s19, 4  ;;  %s1784_s22 = scalar_lea.hbm %s2428_s9, 608  ;;  %s1774_s27 = int_to_ptr.hbm [resolvable:$true] %s1773_s27 }
 0x36d   : > { %s1780_s15 = scalar_lea.hbm %s1774_s27, %s1756_s17  ;;  %p1785_p3 = scmp.lt.s32.totalorder %s1774_s27, %s2428_s9 }
 0x36e   : > { %p1781_p0 = scmp.ne.s32.totalorder %s1774_s27, %s1780_s15  ;;  %p1786_p4 = scmp.lt.s32.totalorder %s1784_s22, %s1780_s15 }
 0x370   : > { %p1782_p1 = pnand %p1781_p0, %p2366_p5  ;;  %p1787_p6 = por %p1786_p4, %p1785_p3 }
 0x372   : > { %p1783_p2 = pneg %p1782_p1 }
 0x374   : > { %p1788_p13 = pnand %p1787_p6, %p1783_p2 }
 0x376   : > { %1791 = shalt.err (!%p1788_p13)
}
 0x377   : > { %s1837_s25 = smov 256   ;;  %s1838_s17 = smov 16  }
 0x378   : > { %1276 = dma.vmem_to_hbm [thread:$0]  (%p2366_p5), %s2375_s23, %s1549_s18, %s2377_s19, %s1247_s24, %s1837_s25, %s1837_s25, %s1838_s17  }
 0x379 PF: > { %p1612_p9 = scmp.ge.s32.totalorder %s1831_s12, 2  ;;  %s1285_s16 = sand.u32 1, %s1819_s30  }
 0x37a   : > { %s1286_s27 = scalar_lea.sflag [#allocation4], %s1285_s16 }
 0x37b   : > { %p1609_p7 = pnand %p1612_p9, %p1937_p10 }
 0x37d   : > { %p1610_p8 = pneg %p1609_p7 }
 0x37f   : > { %1814 = dma.done.wait (%p1610_p8), %s1286_s27, 4096  }
 0x380   : > { %1816 = vsyncadd (%p1610_p8), %s1286_s27, 4294963200  ;;  %s2445_s12 = sld [smem:[#allocation9_spill]]  ;;  %s2448_s30 = smov %s1823_s10 }
 0x381   : > { %s2446_s15 = sld [smem:[#allocation8_spill]] }
 0x382   : > { %s2447_s11 = sld [smem:[#allocation10_spill]] }
 0x386   : > { %p22_p11 = scmp.ge.s32.totalorder %s2445_s12, 5  }
 0x387   : > { %s2449_s10 = smov %s2446_s15 }
 0x388   :  { %24 = sbr.rel (!%p22_p11) target bundleno = 5 (0x5), region = 104 }
 0x38d   :  { %1292 = vsyncpa [#allocation3], 1 }
 0x38e   :  { %1294 = vsyncpa [#allocation3 + $0x1], 1 }
 0x38f   :  { %1295 = vsyncpa [#allocation4], 1 }
 0x390   :  { %1297 = vsyncpa [#allocation4 + $0x1], 1 }

</bundles_post_ra>
